<compile_context>
chip_gen: v7x
topology: tpu7x:2x2x1
jax: 0.10.0
libtpu: 0.0.40
codegen_flags: <defaults>
</compile_context>

<pallas_src>
import functools

import jax
import jax.numpy as jnp
import numpy as np
from jax import lax
from jax.experimental import pallas as pl
from jax.experimental.pallas import tpu as pltpu

K = 4  # ConvTranspose2d kernel size
S = 2  # stride
P = 1  # padding


# --------------------------- Pallas fused kernel --------------------------- #
def _decoder_kernel(*refs):
    """refs = (x_ref, D_1, ..., D_n, o_ref).

    h_{i+1} = act_i(h_i @ D_i): ReLU for hidden layers, Sigmoid for the last.
    All operands are VMEM-resident; one MXU contraction per layer.
    """
    x_ref, *d_refs, o_ref = refs
    h = x_ref[...]
    n = len(d_refs)
    for i, d_ref in enumerate(d_refs):
        z = jnp.dot(h, d_ref[...], preferred_element_type=jnp.float32)
        if i < n - 1:
            h = jnp.maximum(z, 0.0)                      # ReLU
        else:
            # Sigmoid: exp on the EUP; reciprocal seeded on the EUP
            # (approx=True) + two Newton steps -> ~f32-exact, no long VALU
            # divide sequence (matters on v5e, free elsewhere).
            den = 1.0 + jnp.exp(-z)
            r = pl.reciprocal(den, approx=True)
            r = r * (2.0 - den * r)
            r = r * (2.0 - den * r)
            h = r
    o_ref[...] = h


def _fused_decoder_matmuls(x_flat, dense_ops):
    """Single gridless pallas_call running the whole decoder in VMEM."""
    B = x_flat.shape[0]
    out_dim = dense_ops[-1].shape[1]
    n_in = 1 + len(dense_ops)
    return pl.pallas_call(
        _decoder_kernel,
        out_shape=jax.ShapeDtypeStruct((B, out_dim), jnp.float32),
        in_specs=[pl.BlockSpec(memory_space=pltpu.MemorySpace.VMEM)] * n_in,
        out_specs=pl.BlockSpec(memory_space=pltpu.MemorySpace.VMEM),
    )(x_flat, *dense_ops)


# ------------------- dense ConvTranspose2d operator (glue) ----------------- #
@functools.lru_cache(maxsize=None)
def _deconv_gather_index(IC, OC, H, W, KH, KW):
    """Static index map (numpy, trace-time) from flat weight -> dense operator.

    D[ic*H*W + ih*W + iw, oc*OH*OW + oh*OW + ow] = w[ic, oc, kh, kw]
    with oh = ih*S - P + kh, ow = iw*S - P + kw (transposed-conv relation);
    invalid (oh, ow) entries point at an appended zero slot.
    """
    OH = (H - 1) * S - 2 * P + KH
    OW = (W - 1) * S - 2 * P + KW
    ih = np.arange(H)[:, None]
    oh = np.arange(OH)[None, :]
    kh = oh - S * ih + P                                  # (H, OH)
    iw = np.arange(W)[:, None]
    ow = np.arange(OW)[None, :]
    kw = ow - S * iw + P                                  # (W, OW)
    vh = (kh >= 0) & (kh < KH)
    vw = (kw >= 0) & (kw < KW)
    kh = np.clip(kh, 0, KH - 1)
    kw = np.clip(kw, 0, KW - 1)
    ic = np.arange(IC)
    oc = np.arange(OC)
    # flat index into w.reshape(-1) with w shape (IC, OC, KH, KW)
    idx = (((ic[:, None, None, None, None, None] * OC
             + oc[None, None, None, :, None, None]) * KH
            + kh[None, :, None, None, :, None]) * KW
           + kw[None, None, :, None, None, :])            # (IC,H,W,OC,OH,OW)
    valid = vh[None, :, None, None, :, None] & vw[None, None, :, None, None, :]
    idx = np.where(valid, idx, IC * OC * KH * KW).astype(np.int32)
    return idx.reshape(IC * H * W, OC * OH * OW)


def _dense_deconv_operator(w_pt, H, W):
    """Expand ConvTranspose2d weights (IC, OC, K, K) into a dense matrix.

    Weight-only work (one small gather); the data-dependent compute happens
    inside the Pallas kernel.
    """
    IC, OC, KH, KW = w_pt.shape
    idx = _deconv_gather_index(IC, OC, int(H), int(W), KH, KW)
    w_flat = jnp.concatenate(
        [w_pt.reshape(-1).astype(jnp.float32), jnp.zeros((1,), jnp.float32)])
    return w_flat[idx]                                    # (IC*H*W, OC*OH*OW)


# ------------------------------- forward ----------------------------------- #
def image_decoder_forward(x, weights):
    """Matches ImageDecoder.forward with norm='None'.  Returns NCHW."""
    if x.ndim == 2:
        B, C = x.shape
        H = W = 1
        x_flat = x
    else:
        B, C, H, W = x.shape
        x_flat = x.reshape(B, C * H * W)                  # NCHW-flat

    dense_ops = []
    ic, h, w = C, H, W
    for wt in weights:
        assert wt.shape[0] == ic, (wt.shape, ic)
        dense_ops.append(_dense_deconv_operator(wt, h, w))
        ic = wt.shape[1]
        h = (h - 1) * S - 2 * P + K
        w = (w - 1) * S - 2 * P + K

    out_flat = _fused_decoder_matmuls(x_flat.astype(jnp.float32), dense_ops)
    return out_flat.reshape(B, ic, h, w)                  # NCHW (plain reshape)


def init_decoder_weights(key, input_size, n_channels, ngf, n_layers):
    """Deterministic weights with PyTorch ConvTranspose2d shapes (in, out, 4, 4)."""
    ngf0 = ngf * 2 ** (n_layers - 2)
    chans = [input_size] + [ngf0 // (2 ** i) for i in range(n_layers - 1)] + [n_channels]
    weights = []
    for i in range(n_layers):
        key, sub = jax.random.split(key)
        w = 0.05 * jax.random.normal(sub, (chans[i], chans[i + 1], K, K), jnp.float32)
        weights.append(w)
    return weights


# ------------------------------ reference ---------------------------------- #
def _reference_forward(x, weights):
    """Pure-XLA reference (ConvTranspose2d via lhs-dilated conv)."""
    if x.ndim == 2:
        x = x[:, :, None, None]
    h = x
    n = len(weights)
    for i, w in enumerate(weights):
        w_rot = jnp.transpose(w, (1, 0, 2, 3))[:, :, ::-1, ::-1]  # (OC, IC, K, K)
        h = lax.conv_general_dilated(
            h, w_rot,
            window_strides=(1, 1),
            padding=[(K - 1 - P, K - 1 - P)] * 2,
            lhs_dilation=(S, S),
            dimension_numbers=("NCHW", "OIHW", "NCHW"),
        )
        h = jnp.maximum(h, 0.0) if i < n - 1 else jax.nn.sigmoid(h)
    return h


if __name__ == "__main__":
    B, input_size, n_channels, ngf, n_layers = 2, 16, 3, 8, 3

    key = jax.random.PRNGKey(0)
    kx, kw = jax.random.split(key)
    x = jax.random.normal(kx, (B, input_size), jnp.float32)
    weights = init_decoder_weights(kw, input_size, n_channels, ngf, n_layers)

    fwd = jax.jit(image_decoder_forward)
    out = jax.block_until_ready(fwd(x, weights))
    assert out.shape == (B, n_channels, 2 ** n_layers, 2 ** n_layers), out.shape

    ref = jax.block_until_ready(_reference_forward(x, weights))
    err = float(jnp.max(jnp.abs(out - ref)))
    assert jnp.allclose(out, ref, atol=1e-5, rtol=1e-5), err

    print("KERNEL_OK")
</pallas_src>

<mosaic_0001>
module attributes {stable_mosaic.version = 11 : i64} {
  func.func @_decoder_kernel(%arg0: memref<2x16xf32, #tpu.memory_space<vmem>>, %arg1: memref<16x64xf32, #tpu.memory_space<vmem>>, %arg2: memref<64x128xf32, #tpu.memory_space<vmem>>, %arg3: memref<128x192xf32, #tpu.memory_space<vmem>>, %arg4: memref<2x192xf32, #tpu.memory_space<vmem>>) attributes {dimension_semantics = [], scalar_prefetch = 0 : i64, scratch_operands = 0 : i64, tpu.core_type = #tpu.core_type<tc>} {
    %c0 = arith.constant 0 : index
    %c0_0 = arith.constant 0 : index
    %0 = vector.load %arg0[%c0, %c0_0] : memref<2x16xf32, #tpu.memory_space<vmem>>, vector<2x16xf32>
    %c0_1 = arith.constant 0 : index
    %c0_2 = arith.constant 0 : index
    %1 = vector.load %arg1[%c0_1, %c0_2] : memref<16x64xf32, #tpu.memory_space<vmem>>, vector<16x64xf32>
    %cst = arith.constant dense<0.000000e+00> : vector<2x64xf32>
    %2 = tpu.matmul %0, %1, %cst {dimension_numbers = #tpu.dot_dimension_numbers<[1], [0], [0], [1], [0, 0, 1, 1], [], []>} : vector<2x16xf32>, vector<16x64xf32>, vector<2x64xf32> -> vector<2x64xf32>
    %cst_3 = arith.constant 0.000000e+00 : f32
    %3 = vector.broadcast %cst_3 : f32 to vector<2x64xf32>
    %4 = arith.maximumf %2, %3 : vector<2x64xf32>
    %c0_4 = arith.constant 0 : index
    %c0_5 = arith.constant 0 : index
    %5 = vector.load %arg2[%c0_4, %c0_5] : memref<64x128xf32, #tpu.memory_space<vmem>>, vector<64x128xf32>
    %cst_6 = arith.constant dense<0.000000e+00> : vector<2x128xf32>
    %6 = tpu.matmul %4, %5, %cst_6 {dimension_numbers = #tpu.dot_dimension_numbers<[1], [0], [0], [1], [0, 0, 1, 1], [], []>} : vector<2x64xf32>, vector<64x128xf32>, vector<2x128xf32> -> vector<2x128xf32>
    %cst_7 = arith.constant 0.000000e+00 : f32
    %7 = vector.broadcast %cst_7 : f32 to vector<2x128xf32>
    %8 = arith.maximumf %6, %7 : vector<2x128xf32>
    %c0_8 = arith.constant 0 : index
    %c0_9 = arith.constant 0 : index
    %9 = vector.load %arg3[%c0_8, %c0_9] : memref<128x192xf32, #tpu.memory_space<vmem>>, vector<128x192xf32>
    %cst_10 = arith.constant dense<0.000000e+00> : vector<2x192xf32>
    %10 = tpu.matmul %8, %9, %cst_10 {dimension_numbers = #tpu.dot_dimension_numbers<[1], [0], [0], [1], [0, 0, 1, 1], [], []>} : vector<2x128xf32>, vector<128x192xf32>, vector<2x192xf32> -> vector<2x192xf32>
    %cst_11 = arith.constant 0.000000e+00 : f32
    %11 = vector.broadcast %cst_11 : f32 to vector<2x192xf32>
    %12 = arith.subf %11, %10 : vector<2x192xf32>
    %13 = math.exp %12 : vector<2x192xf32>
    %cst_12 = arith.constant 1.000000e+00 : f32
    %14 = vector.broadcast %cst_12 : f32 to vector<2x192xf32>
    %15 = arith.addf %14, %13 : vector<2x192xf32>
    %16 = tpu.reciprocal %15 {approx = true} : vector<2x192xf32> -> vector<2x192xf32>
    %17 = arith.mulf %15, %16 : vector<2x192xf32>
    %cst_13 = arith.constant 2.000000e+00 : f32
    %18 = vector.broadcast %cst_13 : f32 to vector<2x192xf32>
    %19 = arith.subf %18, %17 : vector<2x192xf32>
    %20 = arith.mulf %16, %19 : vector<2x192xf32>
    %21 = arith.mulf %15, %20 : vector<2x192xf32>
    %cst_14 = arith.constant 2.000000e+00 : f32
    %22 = vector.broadcast %cst_14 : f32 to vector<2x192xf32>
    %23 = arith.subf %22, %21 : vector<2x192xf32>
    %24 = arith.mulf %20, %23 : vector<2x192xf32>
    %c0_15 = arith.constant 0 : index
    %c0_16 = arith.constant 0 : index
    %25 = vector.load %arg4[%c0_15, %c0_16] : memref<2x192xf32, #tpu.memory_space<vmem>>, vector<2x192xf32>
    tpu.vector_store %arg4[%c0_15, %c0_16], %24 {strides = array<i32>} : memref<2x192xf32, #tpu.memory_space<vmem>>, vector<2x192xf32>,
    return
  }
}

</mosaic_0001>

<bundles_post_ra>
// kernel: image_decoder_forward.1
= control target key start
LH: loop header
LB: loop body
LE: loop exit
PB: predicated region body
PF: predicated region fallthrough
CT: control target
= control target key end

     0   :  { %v421_v0 = vmov 0.0|0.0   ;;  %vm422_vm0 = vmmov 0   ;;  %v423_v3 = vmov 0.0   ;;  %vm20_vm1 = vcmask 130048   ;;  %s584_s1 = inlined_call_operand.vmem [shape: f32[16,64], index: 1, kind: input, shape index: {}]   ;;  %s585_s2 = inlined_call_operand.vmem [shape: f32[64,128], index: 2, kind: input, shape index: {}]   ;;  %s586_s0 = inlined_call_operand.vmem [shape: f32[2,16], index: 0, kind: input, shape index: {}]   ;;  %s587_s3 = inlined_call_operand.vmem [shape: f32[128,192], index: 3, kind: input, shape index: {}]   ;;  %s588_s4 = inlined_call_operand.vmem [shape: f32[2,192], index: 4, kind: output, shape index: {}]  }
   0x1   :  { %362 = vmatprep.subr.bf16.mxu1 %v421_v0  ;;  %v18_v1 = vld [vmem:[%s584_s1] sm:$0xff]  ;;  %v19_v2 = vld [vmem:[%s584_s1 + $0x8] sm:$0xff]  ;;  %340 = vmatprep.mubr.msk.f32.mxu1 %vm422_vm0, %v423_v3  ;;  %v97_v9 = vld [vmem:[%s585_s2 + $0x10] sm:$0xff]  ;;  %vm103_vm2 = vcmask 523264   ;;  %vm314_vm3 = vcmask 1041408   ;;  %vm315_vm4 = vcmask 519170  }
   0x2   :  { %v363_v4 = vpack.c.bf16 %v19_v2, %v18_v1  ;;  %v95_v5 = vld [vmem:[%s585_s2] sm:$0xff]  ;;  %v96_v6 = vld [vmem:[%s585_s2 + $0x8] sm:$0xff]  ;;  %274 = vmatprep.mubr.f32.mxu0 %v423_v3  ;;  %v98_v10 = vld [vmem:[%s585_s2 + $0x18] sm:$0xff] }
   0x3   :  { %v17_v7 = vld [vmem:[%s586_s0] sm:$0x3]  ;;  %v366_v8 = vpack.c.bf16 %v96_v6, %v95_v5  ;;  %v369_v11 = vpack.c.bf16 %v98_v10, %v97_v9  ;;  %v100_v13 = vld [vmem:[%s585_s2 + $0x28] sm:$0xff]  ;;  %v101_v15 = vld [vmem:[%s585_s2 + $0x30] sm:$0xff] }
   0x4   :  { %364 = vmatpush3.bf16.msra.mxu1 %v363_v4  ;;  %v99_v12 = vld [vmem:[%s585_s2 + $0x20] sm:$0xff]  ;;  %v102_v16 = vld [vmem:[%s585_s2 + $0x38] sm:$0xff]  ;;  %v179_v18 = vld [vmem:[%s587_s3 + $0x8] sm:$0xff] }
   0x5   :  { %365 = vmatprep.subr.bf16.mxu1 %v421_v0  ;;  %v372_v14 = vpack.c.bf16 %v100_v13, %v99_v12  ;;  %v375_v17 = vpack.c.bf16 %v102_v16, %v101_v15  ;;  %v181_v19 = vld [vmem:[%s587_s3 + $0x18] sm:$0xff]  ;;  %v178_v20 = vld [vmem:[%s587_s3] sm:$0xff]  ;;  %v180_v22 = vld [vmem:[%s587_s3 + $0x10] sm:$0xff] }
   0x6   :  { %v377_v21 = vpack.c.bf16 %v181_v19, %v179_v18  ;;  %v183_v23 = vld [vmem:[%s587_s3 + $0x28] sm:$0xff]  ;;  %v185_v24 = vld [vmem:[%s587_s3 + $0x38] sm:$0xff]  ;;  %v379_v25 = vpack.c.bf16 %v180_v22, %v178_v20  ;;  %v182_v27 = vld [vmem:[%s587_s3 + $0x20] sm:$0xff] }
   0x7   :  { %341 = vmatmul.mubr.msk.f32.vlgmr.msra.gmra.mrb[0].mxu1 %vm20_vm1, %v17_v7  ;;  %v381_v26 = vpack.c.bf16 %v185_v24, %v183_v23  ;;  %v184_v28 = vld [vmem:[%s587_s3 + $0x30] sm:$0xff]  ;;  %v187_v29 = vld [vmem:[%s587_s3 + $0x48] sm:$0xff]  ;;  %v189_v30 = vld [vmem:[%s587_s3 + $0x58] sm:$0xff]  ;;  %v424_v24 = vmov 1983009808  }
   0x8   :  { %367 = vmatpush3.bf16.msra.mxu1 %v366_v8  ;;  %359 = vmatprep.mubr.msk.f32.mxu1 %vm422_vm0, %v423_v3  ;;  %v383_v31 = vpack.c.bf16 %v184_v28, %v182_v27  ;;  %v385_v32 = vpack.c.bf16 %v189_v30, %v187_v29  ;;  %v186_v33 = vld [vmem:[%s587_s3 + $0x40] sm:$0xff]  ;;  %v188_v34 = vld [vmem:[%s587_s3 + $0x50] sm:$0xff]  ;;  %v191_v35 = vld [vmem:[%s587_s3 + $0x68] sm:$0xff] }
   0x9   :  { %368 = vmatprep.subr.bf16.mxu1 %v421_v0  ;;  %378 = vmatprep.subr.bf16.mxu0 %v377_v21  ;;  %v193_v36 = vld [vmem:[%s587_s3 + $0x78] sm:$0xff]  ;;  %v387_v37 = vpack.c.bf16 %v188_v34, %v186_v33  ;;  %v190_v39 = vld [vmem:[%s587_s3 + $0x60] sm:$0xff]  ;;  %v192_v40 = vld [vmem:[%s587_s3 + $0x70] sm:$0xff] }
   0xa   :  { %380 = vmatpush1.bf16.msra.mxu0 %v379_v25  ;;  %v389_v38 = vpack.c.bf16 %v193_v36, %v191_v35  ;;  %v195_v41 = vld [vmem:[%s587_s3 + $0x88] sm:$0xff]  ;;  %v197_v42 = vld [vmem:[%s587_s3 + $0x98] sm:$0xff]  ;;  %v391_v43 = vpack.c.bf16 %v192_v40, %v190_v39  ;;  %v194_v45 = vld [vmem:[%s587_s3 + $0x80] sm:$0xff]  ;;  %v307_v25 = vunpack.c.l.s4 %v424_v24 }
   0xb   :  { %382 = vmatprep.subr.bf16.mxu0 %v381_v26  ;;  %v393_v44 = vpack.c.bf16 %v197_v42, %v195_v41  ;;  %v196_v46 = vld [vmem:[%s587_s3 + $0x90] sm:$0xff]  ;;  %v199_v47 = vld [vmem:[%s587_s3 + $0xa8] sm:$0xff]  ;;  %v201_v48 = vld [vmem:[%s587_s3 + $0xb8] sm:$0xff]  ;;  %v309_v26 = vlaneseq }
   0xc   :  { %370 = vmatpush3.bf16.msra.mxu1 %v369_v11  ;;  %v395_v49 = vpack.c.bf16 %v196_v46, %v194_v45  ;;  %v397_v50 = vpack.c.bf16 %v201_v48, %v199_v47  ;;  %v198_v51 = vld [vmem:[%s587_s3 + $0xa0] sm:$0xff]  ;;  %v200_v52 = vld [vmem:[%s587_s3 + $0xb0] sm:$0xff]  ;;  %v203_v53 = vld [vmem:[%s587_s3 + $0xc8] sm:$0xff] }
   0xd   :  { %371 = vmatprep.subr.bf16.mxu1 %v421_v0  ;;  %v205_v54 = vld [vmem:[%s587_s3 + $0xd8] sm:$0xff]  ;;  %v399_v55 = vpack.c.bf16 %v200_v52, %v198_v51  ;;  %v202_v57 = vld [vmem:[%s587_s3 + $0xc0] sm:$0xff]  ;;  %v204_v58 = vld [vmem:[%s587_s3 + $0xd0] sm:$0xff] }
   0xe   :  { %384 = vmatpush1.bf16.msra.mxu0 %v383_v31  ;;  %v401_v56 = vpack.c.bf16 %v205_v54, %v203_v53  ;;  %v207_v59 = vld [vmem:[%s587_s3 + $0xe8] sm:$0xff]  ;;  %v209_v60 = vld [vmem:[%s587_s3 + $0xf8] sm:$0xff]  ;;  %v403_v61 = vpack.c.bf16 %v204_v58, %v202_v57  ;;  %v206_v2 = vld [vmem:[%s587_s3 + $0xe0] sm:$0xff]  ;;  %v308_v31 = vunpack.c.0.s8 %v307_v25 }
   0xf   :  { %386 = vmatprep.subr.bf16.mxu0 %v385_v32  ;;  %v405_v62 = vpack.c.bf16 %v209_v60, %v207_v59  ;;  %v208_v3 = vld [vmem:[%s587_s3 + $0xf0] sm:$0xff]  ;;  %v310_v32 = vshrl.u32 %v309_v26, 7  ;;  %vm316_vm5 = vmor %vm315_vm4, %vm314_vm3 }
  0x10   :  { %373 = vmatpush3.bf16.msra.mxu1 %v372_v14  ;;  %v407_v4 = vpack.c.bf16 %v208_v3, %v206_v2 }
  0x11   :  { %374 = vmatprep.subr.bf16.mxu1 %v421_v0 }
  0x12   :  { %388 = vmatpush1.bf16.msra.mxu0 %v387_v37  ;;  %v311_v37 = vsub.s32 %v308_v31, %v310_v32 }
  0x13   :  { %390 = vmatprep.subr.bf16.mxu0 %v389_v38 }
  0x14   :  { %376 = vmatpush3.bf16.msra.mxu1 %v375_v17 }
  0x16   :  { %392 = vmatpush1.bf16.msra.mxu0 %v391_v43 }
  0x17   :  { %394 = vmatprep.subr.bf16.mxu0 %v393_v44 }
  0x1a   :  { %396 = vmatpush1.bf16.msra.mxu0 %v395_v49 }
  0x1b   :  { %398 = vmatprep.subr.bf16.mxu0 %v397_v50 }
  0x1e   :  { %400 = vmatpush1.bf16.msra.mxu0 %v399_v55 }
  0x1f   :  { %402 = vmatprep.subr.bf16.mxu0 %v401_v56 }
  0x22   :  { %404 = vmatpush1.bf16.msra.mxu0 %v403_v61 }
  0x23   :  { %406 = vmatprep.subr.bf16.mxu0 %v405_v62 }
  0x26   :  { %408 = vmatpush1.bf16.msra.mxu0 %v407_v4 }
  0xda   :  { %v90_v63 = vpop.f32.mrb[0].mxu1 }
  0xdb   :  { %v94_v0 = vmax.f32 %v90_v63, 0.0  ;;  %v342_v1 = vpop.f32.mrb[1].mxu1 }
  0xdd   :  { %360 = vmatmul.mubr.msk.f32.vlgmr.msra.gmra.mrb[2].mxu1 %vm103_vm2, %v94_v0 }
 0x1b0   :  { %v173_v5 = vpop.f32.mrb[2].mxu1 }
 0x1b1   :  { %v177_v6 = vmax.f32 %v173_v5, 0.0  ;;  %v361_v7 = vpop.f32.mrb[3].mxu1 }
 0x1b3   :  { %275 = vmatmul.mubr.f32.vlgmr.msra.gmra.mrb[0].mxu0 %v177_v6 }
 0x286   :  { %v276_v8 = vpop.f32.mrb[0].mxu0 }
 0x287   :  { %v281_v9 = vsub.f32 0.0, %v276_v8  ;;  %v278_v10 = vpop.f32.mrb[1].mxu0 }
 0x288   :  { %v282_v11 = vsub.f32 0.0, %v278_v10 }
 0x289   :  { %v283_v12 = vmul.f32 1.442695, %v281_v9 }
 0x28a   :  { %v285_v13 = vmul.f32 1.442695, %v282_v11 }
 0x28b   :  { %413 = vpow2.f32 %v283_v12 }
 0x28c   :  { %415 = vpow2.f32 %v285_v13 }
 0x295   :  { %v414_v14 = vpop.eup %413 }
 0x296   :  { %v416_v15 = vpop.eup %415  ;;  %v287_v16 = vadd.f32 1.0, %v414_v14 }
 0x297   :  { %v288_v17 = vadd.f32 1.0, %v416_v15 }
 0x298   :  { %417 = vrcp.f32 %v287_v16 }
 0x299   :  { %419 = vrcp.f32 %v288_v17 }
 0x2a2   :  { %v418_v18 = vpop.eup %417 }
 0x2a3   :  { %v420_v19 = vpop.eup %419  ;;  %v291_v20 = vmul.f32 %v418_v18, %v287_v16 }
 0x2a4   :  { %v292_v21 = vmul.f32 %v420_v19, %v288_v17 }
 0x2a5   :  { %v293_v22 = vsub.f32 2.0, %v291_v20 }
 0x2a6   :  { %v294_v23 = vsub.f32 2.0, %v292_v21 }
 0x2a7   :  { %v295_v27 = vmul.f32 %v418_v18, %v293_v22 }
 0x2a8   :  { %v296_v28 = vmul.f32 %v420_v19, %v294_v23 }
 0x2a9   :  { %v297_v29 = vmul.f32 %v295_v27, %v287_v16 }
 0x2aa   :  { %v298_v30 = vmul.f32 %v296_v28, %v288_v17 }
 0x2ab   :  { %v299_v33 = vsub.f32 2.0, %v297_v29 }
 0x2ac   :  { %v300_v34 = vsub.f32 2.0, %v298_v30 }
 0x2ad   :  { %v301_v35 = vmul.f32 %v299_v33, %v295_v27 }
 0x2ae   :  { %v302_v36 = vmul.f32 %v300_v34, %v296_v28 }
 0x2b0   :  { %v305_v38 = vcombine.low %v301_v35, %v302_v36 }
 0x2b2   :  { %v312_v39 = vrot.slane %v305_v38, %v311_v37 }
 0x2b4   :  { %317 = vst.msk [vmem:[%s588_s4] sm:$0xf] %vm316_vm5, %v312_v39 }

</bundles_post_ra>
